<compile_context>
chip_gen: v6e
topology: v6e:2x2x1
jax: 0.10.0
libtpu: 0.0.40
codegen_flags: <defaults>
</compile_context>

<pallas_src>
import functools

import jax
import jax.numpy as jnp
from jax.experimental import pallas as pl
from jax.experimental.pallas import tpu as pltpu


# ---------------------------------------------------------------------------
# helpers
# ---------------------------------------------------------------------------

def _fit(dim, pref):
    """Pick a tile size: prefer `pref`, fall back to 512/256/128, else the
    full dimension (always a legal block: block == full dim)."""
    for t in (pref, 512, 256, 128):
        if dim % t == 0:
            return t
    return dim


def _pad_rows(x, mult=8):
    """Pad the leading (row) dim up to a multiple of `mult` so tiling stays
    sublane-aligned instead of relying on the full-dim fallback."""
    M = x.shape[0]
    pad = (-M) % mult
    if pad:
        x = jnp.pad(x, ((0, pad), (0, 0)))
    return x, M


_VMEM_LIMIT = 48 * 1024 * 1024  # safe on v5e/v6e (128 MiB) and v7x (64 MiB)


# ---------------------------------------------------------------------------
# Tiled dense (optionally activated), bf16 operands -> f32 accumulator
# ---------------------------------------------------------------------------

def _dense_kernel(x_ref, w_ref, b_ref, o_ref, acc_ref, *, activation):
    @pl.when(pl.program_id(2) == 0)
    def _():
        acc_ref[...] = jnp.zeros_like(acc_ref)

    acc_ref[...] += jnp.dot(x_ref[...], w_ref[...],
                            preferred_element_type=jnp.float32)

    @pl.when(pl.program_id(2) == pl.num_programs(2) - 1)
    def _():
        y = acc_ref[...] + b_ref[...]
        if activation == "gelu":
            # exact erf-GELU (matches HF BERT); erf lowers to the EUP.
            y = 0.5 * y * (1.0 + jax.lax.erf(y * 0.7071067811865475))
        elif activation == "tanh":
            y = jnp.tanh(y)
        o_ref[...] = y.astype(o_ref.dtype)


def dense(x, w, b, activation=None, *, out_dtype=jnp.bfloat16,
          tm=512, tn=512, tk=512):
    """y = act(x @ w + b), tiled over (M, N, K) with a f32 VMEM accumulator."""
    x = x.astype(jnp.bfloat16)
    w = w.astype(jnp.bfloat16)
    x, M0 = _pad_rows(x)
    M, K = x.shape
    K2, N = w.shape
    assert K == K2
    tm, tn = _fit(M, tm), _fit(N, tn)
    tk = K if K <= 1024 else _fit(K, tk)
    kern = functools.partial(_dense_kernel, activation=activation)
    out = pl.pallas_call(
        kern,
        out_shape=jax.ShapeDtypeStruct((M, N), out_dtype),
        grid=(M // tm, N // tn, K // tk),
        in_specs=[
            pl.BlockSpec((tm, tk), lambda i, j, k: (i, k)),
            pl.BlockSpec((tk, tn), lambda i, j, k: (k, j)),
            pl.BlockSpec((1, tn), lambda i, j, k: (0, j)),
        ],
        out_specs=pl.BlockSpec((tm, tn), lambda i, j, k: (i, j)),
        scratch_shapes=[pltpu.VMEM((tm, tn), jnp.float32)],
        compiler_params=pltpu.CompilerParams(
            dimension_semantics=("parallel", "parallel", "arbitrary"),
            vmem_limit_bytes=_VMEM_LIMIT),
    )(x, w, b.reshape(1, N).astype(jnp.float32))
    return out if M == M0 else out[:M0]


# ---------------------------------------------------------------------------
# Tiled dense with fused bias + residual-add + LayerNorm epilogue
# (output N = H is kept whole so the row statistics are exact)
# ---------------------------------------------------------------------------

def _dense_add_ln_kernel(x_ref, w_ref, b_ref, r_ref, g_ref, beta_ref,
                         o_ref, acc_ref):
    @pl.when(pl.program_id(1) == 0)
    def _():
        acc_ref[...] = jnp.zeros_like(acc_ref)

    acc_ref[...] += jnp.dot(x_ref[...], w_ref[...],
                            preferred_element_type=jnp.float32)

    @pl.when(pl.program_id(1) == pl.num_programs(1) - 1)
    def _():
        y = acc_ref[...] + b_ref[...] + r_ref[...].astype(jnp.float32)
        mu = jnp.mean(y, axis=-1, keepdims=True)
        yc = y - mu
        var = jnp.mean(yc * yc, axis=-1, keepdims=True)
        out = yc * jax.lax.rsqrt(var + 1e-12) * g_ref[...] + beta_ref[...]
        o_ref[...] = out.astype(o_ref.dtype)


def dense_add_layernorm(x, w, b, residual, gamma, beta, *,
                        out_dtype=jnp.bfloat16, tm=512, tk=512):
    """LayerNorm(x @ w + b + residual), K tiled, full H per output block."""
    x = x.astype(jnp.bfloat16)
    w = w.astype(jnp.bfloat16)
    residual = residual.astype(jnp.bfloat16)
    x, M0 = _pad_rows(x)
    residual, _ = _pad_rows(residual)
    M, K = x.shape
    _, N = w.shape
    tm = _fit(M, tm)
    tk = K if K <= 1024 else _fit(K, tk)
    out = pl.pallas_call(
        _dense_add_ln_kernel,
        out_shape=jax.ShapeDtypeStruct((M, N), out_dtype),
        grid=(M // tm, K // tk),
        in_specs=[
            pl.BlockSpec((tm, tk), lambda i, k: (i, k)),
            pl.BlockSpec((tk, N), lambda i, k: (k, 0)),
            pl.BlockSpec((1, N), lambda i, k: (0, 0)),
            pl.BlockSpec((tm, N), lambda i, k: (i, 0)),
            pl.BlockSpec((1, N), lambda i, k: (0, 0)),
            pl.BlockSpec((1, N), lambda i, k: (0, 0)),
        ],
        out_specs=pl.BlockSpec((tm, N), lambda i, k: (i, 0)),
        scratch_shapes=[pltpu.VMEM((tm, N), jnp.float32)],
        compiler_params=pltpu.CompilerParams(
            dimension_semantics=("parallel", "arbitrary"),
            vmem_limit_bytes=_VMEM_LIMIT),
    )(x, w, b.reshape(1, N).astype(jnp.float32), residual,
      gamma.reshape(1, N).astype(jnp.float32),
      beta.reshape(1, N).astype(jnp.float32))
    return out if M == M0 else out[:M0]


# ---------------------------------------------------------------------------
# Standalone LayerNorm (no residual) for the embedding output
# ---------------------------------------------------------------------------

def _layernorm_kernel(x_ref, g_ref, b_ref, o_ref):
    x = x_ref[...].astype(jnp.float32)
    mu = jnp.mean(x, axis=-1, keepdims=True)
    xc = x - mu
    var = jnp.mean(xc * xc, axis=-1, keepdims=True)
    out = xc * jax.lax.rsqrt(var + 1e-12) * g_ref[...] + b_ref[...]
    o_ref[...] = out.astype(o_ref.dtype)


def layernorm(x, gamma, beta, *, out_dtype=jnp.bfloat16, tm=512):
    x, M0 = _pad_rows(x)
    M, H = x.shape
    tm = _fit(M, tm)
    out = pl.pallas_call(
        _layernorm_kernel,
        out_shape=jax.ShapeDtypeStruct((M, H), out_dtype),
        grid=(M // tm,),
        in_specs=[
            pl.BlockSpec((tm, H), lambda i: (i, 0)),
            pl.BlockSpec((1, H), lambda i: (0, 0)),
            pl.BlockSpec((1, H), lambda i: (0, 0)),
        ],
        out_specs=pl.BlockSpec((tm, H), lambda i: (i, 0)),
        compiler_params=pltpu.CompilerParams(
            dimension_semantics=("parallel",)),
    )(x, gamma.reshape(1, H).astype(jnp.float32),
      beta.reshape(1, H).astype(jnp.float32))
    return out if M == M0 else out[:M0]


# ---------------------------------------------------------------------------
# Multi-head self-attention
#   * one grid step per batch item, all heads processed in that step
#   * per-head Q/K/V read through static ref slices of the fused (S, 3H) block
#     (the full block is never loaded as a single value)
#   * mask-bias broadcast hoisted out of the head loop
#   * per-head context accumulated into a VMEM (S, H) scratch; output written
#     once per batch item, lane-dense, as bf16
#   * bf16 MXU operands, f32 scores / softmax
# ---------------------------------------------------------------------------

def _attention_kernel(qkv_ref, bias_ref, o_ref, ctx_ref, *, nH, dH, scale):
    H = nH * dH
    S = qkv_ref.shape[1]
    # Hoisted: one (1,S) -> (S,S) broadcast, reused by every head.
    bias = jnp.broadcast_to(bias_ref[0], (S, S))
    # TODO(synk): for long sequences (S >~ 1-2k) this should be key-block tiled
    # (flash-attention style) with a (B, nH, q-block) grid instead of
    # materializing full SxS scores per head.
    for h in range(nH):
        qh = qkv_ref[0, :, h * dH:(h + 1) * dH].astype(jnp.bfloat16)
        kh = qkv_ref[0, :, H + h * dH:H + (h + 1) * dH].astype(jnp.bfloat16)
        vh = qkv_ref[0, :, 2 * H + h * dH:2 * H + (h + 1) * dH].astype(jnp.bfloat16)
        s = jax.lax.dot_general(
            qh, kh, (((1,), (1,)), ((), ())),
            preferred_element_type=jnp.float32) * scale          # (S, S) f32
        s = s + bias
        s_max = jnp.max(s, axis=-1, keepdims=True)
        p = jnp.exp(s - s_max)
        denom = jnp.sum(p, axis=-1, keepdims=True)
        p = p * pl.reciprocal(denom, approx=True)
        ctx_ref[:, h * dH:(h + 1) * dH] = jnp.dot(
            p.astype(jnp.bfloat16), vh, preferred_element_type=jnp.float32)
    # Single lane-dense store of the whole (S, H) context block.
    o_ref[0] = ctx_ref[...].astype(o_ref.dtype)


def attention(qkv, mask_bias, nH, dH):
    """qkv: (B, S, 3H) fused projections (bf16); mask_bias: (B, 1, S) additive."""
    B, S, threeH = qkv.shape
    H = nH * dH
    scale = 1.0 / (dH ** 0.5)
    kern = functools.partial(_attention_kernel, nH=nH, dH=dH, scale=scale)
    return pl.pallas_call(
        kern,
        out_shape=jax.ShapeDtypeStruct((B, S, H), jnp.bfloat16),
        grid=(B,),
        in_specs=[
            pl.BlockSpec((1, S, threeH), lambda b: (b, 0, 0)),
            pl.BlockSpec((1, 1, S), lambda b: (b, 0, 0)),
        ],
        out_specs=pl.BlockSpec((1, S, H), lambda b: (b, 0, 0)),
        scratch_shapes=[pltpu.VMEM((S, H), jnp.float32)],
        compiler_params=pltpu.CompilerParams(
            dimension_semantics=("parallel",),
            vmem_limit_bytes=_VMEM_LIMIT),
    )(qkv.astype(jnp.bfloat16), mask_bias.astype(jnp.float32))


# ---------------------------------------------------------------------------
# Fused pooler + classification heads: out = tanh(cls @ Wp + bp) @ Wh + bh
# ---------------------------------------------------------------------------

def _pooler_heads_kernel(cls_ref, pw_ref, pb_ref, hw_ref, hb_ref, o_ref):
    pooled = jnp.tanh(
        jnp.dot(cls_ref[...], pw_ref[...], preferred_element_type=jnp.float32)
        + pb_ref[...])
    o_ref[...] = (jnp.dot(pooled.astype(jnp.bfloat16), hw_ref[...],
                          preferred_element_type=jnp.float32) + hb_ref[...])


def pooler_heads(cls, pool_w, pool_b, heads_w, heads_b):
    cls = cls.astype(jnp.bfloat16)
    B, H = cls.shape
    NH = heads_w.shape[1]
    return pl.pallas_call(
        _pooler_heads_kernel,
        out_shape=jax.ShapeDtypeStruct((B, NH), jnp.float32),
        grid=(1,),
        in_specs=[
            pl.BlockSpec((B, H), lambda i: (0, 0)),
            pl.BlockSpec((H, H), lambda i: (0, 0)),
            pl.BlockSpec((1, H), lambda i: (0, 0)),
            pl.BlockSpec((H, NH), lambda i: (0, 0)),
            pl.BlockSpec((1, NH), lambda i: (0, 0)),
        ],
        out_specs=pl.BlockSpec((B, NH), lambda i: (0, 0)),
    )(cls, pool_w.astype(jnp.bfloat16),
      pool_b.reshape(1, H).astype(jnp.float32),
      heads_w.astype(jnp.bfloat16),
      heads_b.reshape(1, NH).astype(jnp.float32))


# ---------------------------------------------------------------------------
# BERT forward (glue in plain JAX, hot paths in the kernels above)
# ---------------------------------------------------------------------------

def bert_encode(params, input_ids, attention_mask, token_type_ids):
    """Runs the BERT encoder and returns the CLS hidden state (B, H)."""
    B, S = input_ids.shape
    cfg = params["cfg"]
    H, nH, dH = cfg["H"], cfg["nH"], cfg["dH"]

    # Embedding gathers stay in plain JAX (no clean Pallas gather on TPU).
    pos_ids = jnp.arange(S, dtype=jnp.int32)
    emb = (jnp.take(params["word_emb"], input_ids, axis=0)
           + jnp.take(params["pos_emb"], pos_ids, axis=0)[None, :, :]
           + jnp.take(params["type_emb"], token_type_ids, axis=0))
    x = layernorm(emb.reshape(B * S, H).astype(jnp.float32),
                  params["emb_ln_g"], params["emb_ln_b"])          # bf16

    # Additive attention-mask bias, computed once and reused by every layer.
    mask_bias = ((1.0 - attention_mask.astype(jnp.float32)) * (-1e9)
                 ).reshape(B, 1, S)

    for lyr in params["layers"]:
        # Fused Q/K/V projection: one matmul, x read from HBM once.
        qkv = dense(x, lyr["qkv_w"], lyr["qkv_b"])                 # (B*S, 3H) bf16
        ctx = attention(qkv.reshape(B, S, 3 * H), mask_bias, nH, dH)
        ctx = ctx.reshape(B * S, H)
        # Attention output projection with fused residual-add + LayerNorm.
        x = dense_add_layernorm(ctx, lyr["o_w"], lyr["o_b"], x,
                                lyr["ln1_g"], lyr["ln1_b"])
        inter = dense(x, lyr["i_w"], lyr["i_b"], activation="gelu")
        # FFN output projection with fused residual-add + LayerNorm.
        x = dense_add_layernorm(inter, lyr["f_w"], lyr["f_b"], x,
                                lyr["ln2_g"], lyr["ln2_b"])

    hidden_states = x.reshape(B, S, H)
    return hidden_states[:, 0, :]                                  # CLS token


def model_forward(params, x):
    """Mirror of Model.forward: x = (context, seq_len, mask) -> (topic, emo)."""
    context = x[0]
    mask = x[2]
    token_type_ids = jnp.zeros_like(context)
    cls = bert_encode(params, context, mask, token_type_ids)
    out = pooler_heads(cls, params["pool_w"], params["pool_b"],
                       params["heads_w"], params["heads_b"])
    n_topic = params["cfg"]["n_topic"]
    topic_out = out[:, :n_topic]
    emo_out = out[:, n_topic:]
    return topic_out, emo_out


# ---------------------------------------------------------------------------
# Deterministic parameter init (synthetic BERT, no checkpoint load)
# ---------------------------------------------------------------------------

def init_params(key, *, vocab=100, H=32, nH=2, L=2, I=64, max_pos=64,
                type_vocab=2, n_topic=10, n_emo=3):
    dH = H // nH
    std = 0.02
    keys = iter(jax.random.split(key, 16 * L + 32))

    def nrm(shape, dtype=jnp.float32):
        return (std * jax.random.normal(next(keys), shape)).astype(dtype)

    def ones(shape):
        return jnp.ones(shape, jnp.float32)

    def zeros(shape):
        return jnp.zeros(shape, jnp.float32)

    layers = []
    for _ in range(L):
        layers.append(dict(
            qkv_w=nrm((H, 3 * H), jnp.bfloat16), qkv_b=zeros((3 * H,)),  # fused Q|K|V
            o_w=nrm((H, H), jnp.bfloat16), o_b=zeros((H,)),
            ln1_g=ones((H,)), ln1_b=zeros((H,)),
            i_w=nrm((H, I), jnp.bfloat16), i_b=zeros((I,)),
            f_w=nrm((I, H), jnp.bfloat16), f_b=zeros((H,)),
            ln2_g=ones((H,)), ln2_b=zeros((H,)),
        ))

    return dict(
        cfg=dict(H=H, nH=nH, dH=dH, n_topic=n_topic, n_emo=n_emo),
        word_emb=nrm((vocab, H)),
        pos_emb=nrm((max_pos, H)),
        type_emb=nrm((type_vocab, H)),
        emb_ln_g=ones((H,)), emb_ln_b=zeros((H,)),
        layers=layers,
        pool_w=nrm((H, H), jnp.bfloat16), pool_b=zeros((H,)),
        heads_w=nrm((H, n_topic + n_emo), jnp.bfloat16),   # fused topic|emo heads
        heads_b=zeros((n_topic + n_emo,)),
    )


# ---------------------------------------------------------------------------

if __name__ == "__main__":
    B, S, H, nH, L, I, VOCAB = 2, 8, 32, 2, 2, 64, 100

    key = jax.random.PRNGKey(0)
    pkey, dkey = jax.random.split(key)
    params = init_params(pkey, vocab=VOCAB, H=H, nH=nH, L=L, I=I)

    input_ids = jax.random.randint(dkey, (B, S), 0, VOCAB, dtype=jnp.int32)
    seq_len = jnp.full((B,), S, dtype=jnp.int32)         # unused by forward (x[1])
    mask = jnp.ones((B, S), dtype=jnp.float32)
    mask = mask.at[1, 6:].set(0.0)                       # pad out last 2 tokens of item 1

    x = (input_ids, seq_len, mask)
    topic_out, emo_out = model_forward(params, x)
    jax.block_until_ready((topic_out, emo_out))

    assert topic_out.shape == (B, 10) and topic_out.dtype == jnp.float32
    assert emo_out.shape == (B, 3) and emo_out.dtype == jnp.float32
    print("KERNEL_OK")
</pallas_src>

<mosaic_0001>
module attributes {stable_mosaic.version = 11 : i64} {
  func.func @_layernorm_kernel(%arg0: i32, %arg1: memref<16x32xf32, #tpu.memory_space<vmem>>, %arg2: memref<1x32xf32, #tpu.memory_space<vmem>>, %arg3: memref<1x32xf32, #tpu.memory_space<vmem>>, %arg4: memref<16x32xbf16, #tpu.memory_space<vmem>>) attributes {dimension_semantics = [#tpu.dimension_semantics<parallel>], iteration_bounds = array<i64: 1>, scalar_prefetch = 0 : i64, scratch_operands = 0 : i64, tpu.core_type = #tpu.core_type<tc>, window_params = [{transform_indices = @transform_0, window_bounds = array<i64: 16, 32>}, {pipeline_mode = #tpu.pipeline_mode<synchronous>, transform_indices = @transform_1, window_bounds = array<i64: 1, 32>}, {pipeline_mode = #tpu.pipeline_mode<synchronous>, transform_indices = @transform_2, window_bounds = array<i64: 1, 32>}, {transform_indices = @transform_3, window_bounds = array<i64: 16, 32>}]} {
    %c0 = arith.constant 0 : index
    %c0_0 = arith.constant 0 : index
    %0 = vector.load %arg1[%c0, %c0_0] : memref<16x32xf32, #tpu.memory_space<vmem>>, vector<16x32xf32>
    %cst = arith.constant dense<0.000000e+00> : vector<16xf32>
    %1 = vector.multi_reduction <add>, %0, %cst [1] : vector<16x32xf32> to vector<16xf32>
    %2 = vector.shape_cast %1 : vector<16xf32> to vector<16x1xf32>
    %cst_1 = arith.constant 3.200000e+01 : f32
    %3 = vector.broadcast %cst_1 : f32 to vector<16x1xf32>
    %4 = arith.divf %2, %3 : vector<16x1xf32>
    %5 = vector.broadcast %4 : vector<16x1xf32> to vector<16x32xf32>
    %6 = arith.subf %0, %5 : vector<16x32xf32>
    %7 = arith.mulf %6, %6 : vector<16x32xf32>
    %cst_2 = arith.constant dense<0.000000e+00> : vector<16xf32>
    %8 = vector.multi_reduction <add>, %7, %cst_2 [1] : vector<16x32xf32> to vector<16xf32>
    %9 = vector.shape_cast %8 : vector<16xf32> to vector<16x1xf32>
    %cst_3 = arith.constant 3.200000e+01 : f32
    %10 = vector.broadcast %cst_3 : f32 to vector<16x1xf32>
    %11 = arith.divf %9, %10 : vector<16x1xf32>
    %cst_4 = arith.constant 9.99999996E-13 : f32
    %12 = vector.broadcast %cst_4 : f32 to vector<16x1xf32>
    %13 = arith.addf %11, %12 : vector<16x1xf32>
    %14 = math.rsqrt %13 : vector<16x1xf32>
    %15 = vector.broadcast %14 : vector<16x1xf32> to vector<16x32xf32>
    %16 = arith.mulf %6, %15 : vector<16x32xf32>
    %c0_5 = arith.constant 0 : index
    %c0_6 = arith.constant 0 : index
    %17 = vector.load %arg2[%c0_5, %c0_6] : memref<1x32xf32, #tpu.memory_space<vmem>>, vector<1x32xf32>
    %18 = vector.broadcast %17 : vector<1x32xf32> to vector<16x32xf32>
    %19 = arith.mulf %16, %18 : vector<16x32xf32>
    %c0_7 = arith.constant 0 : index
    %c0_8 = arith.constant 0 : index
    %20 = vector.load %arg3[%c0_7, %c0_8] : memref<1x32xf32, #tpu.memory_space<vmem>>, vector<1x32xf32>
    %21 = vector.broadcast %20 : vector<1x32xf32> to vector<16x32xf32>
    %22 = arith.addf %19, %21 : vector<16x32xf32>
    %23 = arith.truncf %22 : vector<16x32xf32> to vector<16x32xbf16>
    %c0_9 = arith.constant 0 : index
    %c0_10 = arith.constant 0 : index
    %24 = vector.load %arg4[%c0_9, %c0_10] : memref<16x32xbf16, #tpu.memory_space<vmem>>, vector<16x32xbf16>
    tpu.vector_store %arg4[%c0_9, %c0_10], %23 {strides = array<i32>} : memref<16x32xbf16, #tpu.memory_space<vmem>>, vector<16x32xbf16>,
    return
  }
  func.func @transform_0(%arg0: i32) -> (i32, i32) {
    %c0_i32 = arith.constant 0 : i32
    %c0_i32_0 = arith.constant 0 : i32
    return %arg0, %c0_i32 : i32, i32
  }
  func.func @transform_1(%arg0: i32) -> (i32, i32) {
    %c0_i32 = arith.constant 0 : i32
    %c0_i32_0 = arith.constant 0 : i32
    %c0_i32_1 = arith.constant 0 : i32
    return %c0_i32, %c0_i32_0 : i32, i32
  }
  func.func @transform_2(%arg0: i32) -> (i32, i32) {
    %c0_i32 = arith.constant 0 : i32
    %c0_i32_0 = arith.constant 0 : i32
    %c0_i32_1 = arith.constant 0 : i32
    return %c0_i32, %c0_i32_0 : i32, i32
  }
  func.func @transform_3(%arg0: i32) -> (i32, i32) {
    %c0_i32 = arith.constant 0 : i32
    %c0_i32_0 = arith.constant 0 : i32
    return %arg0, %c0_i32 : i32, i32
  }
}

</mosaic_0001>

<bundles_post_ra>
// kernel: tpu_custom_call.1
= control target key start
LH: loop header
LB: loop body
LE: loop exit
PB: predicated region body
PF: predicated region fallthrough
CT: control target
= control target key end

     0   :  { %8 = vsyncpa [#allocation3], 0  ;;  %s207_s0 = inlined_call_operand.hbm [shape: f32[16,32], index: 0, kind: input, shape index: {}]   ;;  %s208_s1 = inlined_call_operand.vmem [shape: f32[1,32], index: 1, kind: input, shape index: {}]   ;;  %s209_s2 = inlined_call_operand.vmem [shape: f32[1,32], index: 2, kind: input, shape index: {}]   ;;  %s210_s3 = inlined_call_operand.hbm [shape: bf16[16,32], index: 3, kind: output, shape index: {}]  }
   0x1   :  { %9 = vsyncpa [#allocation4], 0  ;;  %s165_s12 = smov [#allocation2]  }
   0x2   :  { %s15_s13 = sshll.u32 %s165_s12, 4  ;;  %s16_s13 = int_to_ptr.vmem [resolvable:$true] %s15_s13 }
   0x3   :  { %s129_s14 = scalar_lea.vmem %s16_s13, 256  ;;  %p134_p1 = scmp.lt.s32.totalorder %s16_s13, %s16_s13 }
   0x4   :  { %p130_p0 = scmp.ne.s32.totalorder %s16_s13, %s129_s14  ;;  %p135_p2 = scmp.lt.s32.totalorder %s129_s14, %s129_s14 }
   0x6   :  { %p136_p3 = por %p135_p2, %p134_p1 }
   0x8   :  { %p137_p4 = pnand %p136_p3, %p130_p0 }
   0xa   :  { %140 = shalt.err (!%p137_p4)
}
   0xb   :  { %s166_s15 = smov 128   ;;  %s167_s16 = smov 8  }
   0xc   :  { %21 = dma.hbm_to_vmem [thread:$0]  %s207_s0, 256, %s16_s13, [#allocation3], %s166_s15, %s166_s15, %s167_s16  }
   0xd   :  { %161 = dma.done.wait [#allocation3], 256  }
   0xe   :  { %162 = vsyncadd [#allocation3], 4294967040  ;;  %vm31_vm0 = vcmask 261120   ;;  %v29_v0 = vld [vmem:[#allocation2] sm:$0xff]  ;;  %v30_v1 = vld [vmem:[#allocation2 + $0x8] sm:$0xff]  ;;  %vm85_vm1 = vcmask 257024  }
   0xf   :  { %v32_v2 = vsel %vm31_vm0, %v29_v0, 0.0  ;;  %v35_v3 = vsel %vm31_vm0, %v30_v1, 0.0  ;;  %v105_v21 = vld [vmem:[%s208_s1] ss:$0 sm:$0xff]  ;;  %s168_s22 = smov [#allocation5]  }
  0x10   :  { %33 = vadd.xlane.f32.xlu0 %v32_v2  ;;  %v106_v23 = vld [vmem:[%s209_s2] ss:$0 sm:$0xff]  ;;  %s93_s23 = sshll.u32 %s168_s22, 4  ;;  %s94_s23 = int_to_ptr.vmem [resolvable:$true] %s93_s23 }
  0x11   :  { %s141_s1 = scalar_lea.vmem %s94_s23, 128  ;;  %p146_p6 = scmp.lt.s32.totalorder %s94_s23, %s94_s23 }
  0x12   :  { %p142_p5 = scmp.ne.s32.totalorder %s94_s23, %s141_s1  ;;  %p147_p7 = scmp.lt.s32.totalorder %s141_s1, %s141_s1 }
  0x14   :  { %36 = vadd.xlane.f32.xlu0 %v35_v3  ;;  %p148_p8 = por %p147_p7, %p146_p6 }
  0x16   :  { %p149_p9 = pnand %p148_p8, %p142_p5 }
  0x99   :  { %v34_v4 = vpop.xlane.xlu0 %33 }
  0x9a   :  { %v39_v5 = vmul.f32 0.03125, %v34_v4 }
  0x9c   :  { %v41_v6 = vsub.f32 %v29_v0, %v39_v5 }
  0x9d   :  { %v37_v7 = vpop.xlane.xlu0 %36 }
  0x9e   :  { %v40_v8 = vmul.f32 0.03125, %v37_v7  ;;  %v43_v9 = vmul.f32 %v41_v6, %v41_v6 }
  0xa0   :  { %v42_v10 = vsub.f32 %v30_v1, %v40_v8  ;;  %v45_v11 = vsel %vm31_vm0, %v43_v9, 0.0 }
  0xa1   :  { %46 = vadd.xlane.f32.xlu1 %v45_v11 }
  0xa2   :  { %v44_v12 = vmul.f32 %v42_v10, %v42_v10 }
  0xa4   :  { %v48_v13 = vsel %vm31_vm0, %v44_v12, 0.0 }
  0xa5   :  { %49 = vadd.xlane.f32.xlu1 %v48_v13 }
 0x12a   :  { %v47_v14 = vpop.xlane.xlu1 %46 }
 0x12b   :  { %v51_v15 = vmul.f32 0.03125, %v47_v14 }
 0x12d   :  { %v53_v16 = vadd.f32 1e-12, %v51_v15 }
 0x12e   :  { %v50_v17 = vpop.xlane.xlu1 %49 }
 0x12f   :  { %117 = vrsqrt.f32 %v53_v16  ;;  %v52_v18 = vmul.f32 0.03125, %v50_v17 }
 0x131   :  { %v54_v19 = vadd.f32 1e-12, %v52_v18 }
 0x133   :  { %119 = vrsqrt.f32 %v54_v19 }
 0x13c   :  { %v118_v20 = vpop.eup %117 }
 0x13d   :  { %v57_v22 = vmul.f32 %v118_v20, %v41_v6 }
 0x13f   :  { %v66_v24 = vmul.f32 %v105_v21, %v57_v22 }
 0x140   :  { %v120_v25 = vpop.eup %119 }
 0x141   :  { %v58_v26 = vmul.f32 %v120_v25, %v42_v10  ;;  %v75_v27 = vadd.f32 %v106_v23, %v66_v24 }
 0x143   :  { %v67_v28 = vmul.f32 %v105_v21, %v58_v26  ;;  %v109_v29 = vpack.c.bf16 %v75_v27, %v75_v27 }
 0x145   :  { %v76_v30 = vadd.f32 %v106_v23, %v67_v28  ;;  %86 = vst.msk [vmem:[#allocation5] sm:$0xf] %vm85_vm1, %v109_v29 }
 0x147   :  { %v110_v31 = vpack.c.bf16 %v76_v30, %v76_v30 }
 0x149   :  { %87 = vst.msk [vmem:[#allocation5 + $0x4] sm:$0xf] %vm85_vm1, %v110_v31 }
 0x14a   :  { %152 = shalt.err (!%p149_p9)
}
 0x14b   :  { %s169_s2 = smov 64   ;;  %s170_s24 = smov 4  }
 0x14c   :  { %99 = dma.vmem_to_hbm [thread:$0]  %s94_s23, 128, %s210_s3, [#allocation4], %s169_s2, %s169_s2, %s170_s24  }
 0x14d   :  { %163 = dma.done.wait [#allocation4], 128  }
 0x14e   :  { %164 = vsyncadd [#allocation4], 4294967168 }
 0x14f   :  { %103 = vsyncpa [#allocation3], 1 }
 0x150   :  { %104 = vsyncpa [#allocation4], 1 }

</bundles_post_ra>
